<compile_context>
chip_gen: v5e
topology: v5e:2x2
jax: 0.10.0
libtpu: 0.0.40
codegen_flags: <defaults>
</compile_context>

<pallas_src>
import functools
import math

import jax
import jax.numpy as jnp
from jax.experimental import pallas as pl
from jax.experimental.pallas import tpu as pltpu


# --------------------------------------------------------------------------
# Config (mirrors the fields ViTConfig / the module __init__ actually uses)
# --------------------------------------------------------------------------
class Config:
    patch_size = 4
    max_image_height = 16
    max_image_width = 16
    num_channels = 4
    hidden_size = 32
    hidden_dropout_prob = 0.0
    initializer_range = 0.02
    use_gabor_position_embeddings = True


def _round_up(n, m):
    return ((n + m - 1) // m) * m


# --------------------------------------------------------------------------
# Fused Pallas kernel: patch projection + bias + pos add + used-patch flag
# --------------------------------------------------------------------------
def _fused_patch_embed_kernel(x_ref, w_ref, b_ref, pos_ref, out_ref, used_ref):
    # x_ref:    (tm, K)   patch rows (f32 or bf16)
    # w_ref:    (K, Hd)   projection weight (f32 or bf16)
    # b_ref:    (1, Hd)   projection bias (f32)
    # pos_ref:  (tm, Hd)  position embeddings for these rows (f32)
    # out_ref:  (tm, Hd)  proj + bias + pos (f32)
    # used_ref: (tm, 1)   1.0 iff any(proj != bias) over hidden (matches torch)
    dot = jnp.dot(x_ref[...], w_ref[...], preferred_element_type=jnp.float32)
    b = b_ref[...]
    proj = dot + b  # == Conv2d output (pre position add)
    used_ref[...] = jnp.max(
        jnp.where(proj != b, 1.0, 0.0), axis=-1, keepdims=True
    )
    out_ref[...] = proj + pos_ref[...]


def fused_patch_embed(patches, weight2d, bias, pos, *, use_bf16=False):
    """patches: (B, N, K) f32, weight2d: (K, Hd) f32, bias: (Hd,), pos: (N, Hd).

    Returns (emb (B, N, Hd) f32, used (B, N) f32 flag)."""
    B, N, K = patches.shape
    Hd = weight2d.shape[1]

    # M tiling: one big row block per batch element; if that leaves fewer than
    # 2 parallel grid blocks, split rows in two so v7x's second TensorCore gets
    # work (near-neutral on single-core v5e/v6e).
    Np = _round_up(N, 8)
    tm = min(512, Np)
    if B * (Np // tm) < 2 and Np >= 16:
        tm = max(8, ((Np // 2) // 8) * 8)
    Np = _round_up(Np, tm)

    if Np != N:
        patches = jnp.pad(patches, ((0, 0), (0, Np - N), (0, 0)))
        pos = jnp.pad(pos, ((0, Np - N), (0, 0)))

    in_dtype = jnp.bfloat16 if use_bf16 else jnp.float32
    x = patches.astype(in_dtype)
    w = weight2d.astype(in_dtype)
    b2 = bias.reshape(1, Hd).astype(jnp.float32)
    pos = pos.astype(jnp.float32)

    bpe = 2 if use_bf16 else 4
    # Rough double-buffered VMEM budget (inputs + both outputs) with generous
    # headroom, capped well under v7x's 64 MiB physical VMEM.
    vmem_need = 2 * (tm * K * bpe + K * Hd * bpe + Hd * 4
                     + 2 * tm * Hd * 4 + tm * 4)
    vmem_limit = int(min(max(4 * vmem_need, 8 << 20), 48 << 20))

    grid = (B, Np // tm)
    emb, used = pl.pallas_call(
        _fused_patch_embed_kernel,
        out_shape=(
            jax.ShapeDtypeStruct((B, Np, Hd), jnp.float32),
            jax.ShapeDtypeStruct((B, Np, 1), jnp.float32),
        ),
        grid=grid,
        in_specs=[
            pl.BlockSpec((None, tm, K), lambda b, i: (b, i, 0)),
            pl.BlockSpec((K, Hd), lambda b, i: (0, 0)),
            pl.BlockSpec((1, Hd), lambda b, i: (0, 0)),
            pl.BlockSpec((tm, Hd), lambda b, i: (i, 0)),
        ],
        out_specs=(
            pl.BlockSpec((None, tm, Hd), lambda b, i: (b, i, 0)),
            pl.BlockSpec((None, tm, 1), lambda b, i: (b, i, 0)),
        ),
        compiler_params=pltpu.CompilerParams(
            dimension_semantics=("parallel", "parallel"),
            vmem_limit_bytes=vmem_limit,
        ),
    )(x, w, b2, pos)
    return emb[:, :N], used[:, :N, 0]


# --------------------------------------------------------------------------
# Gabor position-embedding table: param-only, computed ONCE at init
# --------------------------------------------------------------------------
def precompute_gabor_position_embeddings(gabor_x, gabor_y, edge_weights,
                                         grid_h, grid_w):
    """(4,1,D)/(4,D) params -> (grid_h, grid_w, D) table (hoisted out of the
    per-forward hot path; it does not depend on pixel_values)."""
    D = gabor_x.shape[-1]
    x = jnp.linspace(0.0, 1.0, grid_w, dtype=jnp.float32)[:, None]  # (W, 1)
    y = jnp.linspace(0.0, 1.0, grid_h, dtype=jnp.float32)[:, None]  # (H, 1)
    exp_x2 = jnp.exp(-x * x)
    exp_y2 = jnp.exp(-y * y)
    gx = gabor_x.reshape(4, D)
    gy = gabor_y.reshape(4, D)
    gab_x = exp_x2 ** gx[0] * jnp.cos(gx[1] * x + gx[2]) * gx[3]  # (W, D)
    gab_y = exp_y2 ** gy[0] * jnp.cos(gy[1] * y + gy[2]) * gy[3]  # (H, D)
    pe = gab_x[None, :, :] + gab_y[:, None, :]                    # (H, W, D)
    pe = pe.at[0, :, :].add(edge_weights[0])
    pe = pe.at[-1, :, :].add(edge_weights[1])
    pe = pe.at[:, 0, :].add(edge_weights[2])
    pe = pe.at[:, -1, :].add(edge_weights[3])
    return pe


# --------------------------------------------------------------------------
# Parameter init (deterministic, shapes taken from the module's __init__)
# --------------------------------------------------------------------------
def init_params(key, cfg):
    p = cfg.patch_size
    C, Hd = cfg.num_channels, cfg.hidden_size
    k = jax.random.split(key, 7)

    fan_in = C * p * p
    bound = 1.0 / math.sqrt(fan_in)
    proj_w = jax.random.uniform(k[0], (Hd, C, p, p), jnp.float32, -bound, bound)
    proj_b = jax.random.uniform(k[1], (Hd,), jnp.float32, -bound, bound)

    cls_token = (
        cfg.initializer_range
        * jax.random.truncated_normal(k[2], -2.0, 2.0, (1, 1, Hd), jnp.float32)
    )

    init_mean = jnp.array(
        [2.0, 10.0 * 2.0 * math.pi, 0.0, 0.0], jnp.float32).reshape(4, 1, 1)
    init_radius = jnp.array(
        [2.0, 10.0 * 2.0 * math.pi, math.pi, 1.0], jnp.float32).reshape(4, 1, 1)
    gabor_x = (
        jax.random.uniform(k[3], (4, 1, Hd), jnp.float32, -1.0, 1.0) * init_mean
        + init_radius)
    gabor_y = (
        jax.random.uniform(k[4], (4, 1, Hd), jnp.float32, -1.0, 1.0) * init_mean
        + init_radius)
    edge_weights = jax.random.uniform(k[5], (4, Hd), jnp.float32, -1.0, 1.0)

    grid_rows = math.ceil(cfg.max_image_height / p)
    grid_cols = math.ceil(cfg.max_image_width / p)
    if cfg.use_gabor_position_embeddings:
        pos_table = precompute_gabor_position_embeddings(
            gabor_x, gabor_y, edge_weights, grid_rows, grid_cols)
    else:
        pos_table = cfg.initializer_range * jax.random.truncated_normal(
            k[6], -2.0, 2.0, (grid_rows, grid_cols, Hd), jnp.float32)

    return dict(
        proj_w=proj_w,
        proj_b=proj_b,
        cls_token=cls_token,
        gabor_x=gabor_x,
        gabor_y=gabor_y,
        edge_weights=edge_weights,
        pos_table=pos_table,
    )


# --------------------------------------------------------------------------
# Forward pass: jitted shape-static core + eager dynamic-shape gather
# --------------------------------------------------------------------------
@functools.partial(jax.jit, static_argnames=("patch_size", "use_bf16"))
def _forward_core(pixel_values, proj_w, proj_b, pos_table, cls_token, *,
                  patch_size, use_bf16=False):
    B, C, H, W = pixel_values.shape
    p = patch_size
    Hd = proj_w.shape[0]

    # maybe_pad: pad right / bottom to a multiple of patch_size
    pad_h = (-H) % p
    pad_w = (-W) % p
    if pad_h or pad_w:
        pixel_values = jnp.pad(
            pixel_values, ((0, 0), (0, 0), (0, pad_h), (0, pad_w)))
    Hp = (H + pad_h) // p
    Wp = (W + pad_w) // p
    N = Hp * Wp

    # patch extraction (im2col), feature order (c, i, j) == Conv2d weight.flatten(1)
    # TODO(synk): fold the im2col into the kernel's input BlockSpec DMA for
    # large images to avoid materializing a second copy of the image in HBM.
    patches = (
        pixel_values.reshape(B, C, Hp, p, Wp, p)
        .transpose(0, 2, 4, 1, 3, 5)
        .reshape(B, N, C * p * p)
    )
    weight2d = proj_w.reshape(Hd, C * p * p).T  # (K, Hd)

    # Gabor table was precomputed at init; just slice to the actual patch grid.
    pos = pos_table[:Hp, :Wp, :].reshape(N, Hd)

    emb, used = fused_patch_embed(patches, weight2d, proj_b, pos,
                                  use_bf16=use_bf16)
    used_mask = jnp.any(used > 0.0, axis=0)         # (N,) — any over batch
    cls = jnp.broadcast_to(cls_token, (B, 1, Hd)).astype(emb.dtype)
    return emb, used_mask, cls


def custom_vit_embeddings_forward(pixel_values, params, cfg,
                                  bool_masked_pos=None, use_bf16=False):
    assert pixel_values.shape[1] == cfg.num_channels
    # TODO(synk): mask_token path (use_mask_token=True / bool_masked_pos) not implemented.
    assert bool_masked_pos is None, "bool_masked_pos / mask_token path not supported"

    emb, used_mask, cls = _forward_core(
        pixel_values, params["proj_w"], params["proj_b"], params["pos_table"],
        params["cls_token"], patch_size=cfg.patch_size, use_bf16=use_bf16)

    # Data-dependent boolean gather: the reference module's output length is
    # data-dependent, so this single step stays outside the jitted core.
    emb = emb[:, used_mask]
    out = jnp.concatenate([cls, emb], axis=1)
    # dropout: eval-mode identity (hidden_dropout_prob only applies in training)
    return out


# --------------------------------------------------------------------------
# Pure-JAX (XLA) reference mirroring the PyTorch module, for a sanity check
# --------------------------------------------------------------------------
def _reference_forward(pixel_values, params, cfg):
    B, C, H, W = pixel_values.shape
    p = cfg.patch_size
    Hd = cfg.hidden_size
    pad_h = (-H) % p
    pad_w = (-W) % p
    xpad = jnp.pad(pixel_values, ((0, 0), (0, 0), (0, pad_h), (0, pad_w)))
    Hp = (H + pad_h) // p
    Wp = (W + pad_w) // p
    N = Hp * Wp
    patches = (
        xpad.reshape(B, C, Hp, p, Wp, p)
        .transpose(0, 2, 4, 1, 3, 5)
        .reshape(B, N, C * p * p)
    )
    w2 = params["proj_w"].reshape(Hd, -1).T
    emb = jnp.einsum("bnk,kh->bnh", patches, w2,
                     precision=jax.lax.Precision.HIGHEST) + params["proj_b"]
    pos = params["pos_table"][:Hp, :Wp, :].reshape(1, N, Hd)
    used = jnp.any(jnp.any(emb != params["proj_b"], axis=2), axis=0)
    emb = (emb + pos)[:, used]
    cls = jnp.broadcast_to(params["cls_token"], (B, 1, Hd))
    return jnp.concatenate([cls, emb], axis=1)


# --------------------------------------------------------------------------
if __name__ == "__main__":
    cfg = Config()
    key = jax.random.PRNGKey(0)
    k_param, k_x = jax.random.split(key)

    params = init_params(k_param, cfg)
    pixel_values = jax.random.normal(
        k_x, (2, cfg.num_channels, cfg.max_image_height, cfg.max_image_width),
        jnp.float32)

    out = custom_vit_embeddings_forward(pixel_values, params, cfg)
    out = jax.block_until_ready(out)

    expected_patches = (cfg.max_image_height // cfg.patch_size) * (
        cfg.max_image_width // cfg.patch_size)
    assert out.shape == (2, 1 + expected_patches, cfg.hidden_size), out.shape
    assert out.dtype == jnp.float32

    ref = _reference_forward(pixel_values, params, cfg)
    assert out.shape == ref.shape, (out.shape, ref.shape)
    assert bool(jnp.allclose(out, ref, atol=1e-2, rtol=1e-2)), float(
        jnp.max(jnp.abs(out - ref)))

    print("KERNEL_OK")
</pallas_src>

<mosaic_0001>
module attributes {stable_mosaic.version = 11 : i64} {
  func.func @_fused_patch_embed_kernel(%arg0: i32, %arg1: i32, %arg2: memref<1x16x64xf32, #tpu.memory_space<vmem>>, %arg3: memref<64x32xf32, #tpu.memory_space<vmem>>, %arg4: memref<1x32xf32, #tpu.memory_space<vmem>>, %arg5: memref<16x32xf32, #tpu.memory_space<vmem>>, %arg6: memref<1x16x32xf32, #tpu.memory_space<vmem>>, %arg7: memref<1x16x1xf32, #tpu.memory_space<vmem>>) attributes {dimension_semantics = [#tpu.dimension_semantics<parallel>, #tpu.dimension_semantics<parallel>], iteration_bounds = array<i64: 2, 1>, scalar_prefetch = 0 : i64, scratch_operands = 0 : i64, tpu.core_type = #tpu.core_type<tc>, window_params = [{transform_indices = @transform_0, window_bounds = array<i64: 1, 16, 64>}, {pipeline_mode = #tpu.pipeline_mode<synchronous>, transform_indices = @transform_1, window_bounds = array<i64: 64, 32>}, {pipeline_mode = #tpu.pipeline_mode<synchronous>, transform_indices = @transform_2, window_bounds = array<i64: 1, 32>}, {transform_indices = @transform_3, window_bounds = array<i64: 16, 32>}, {transform_indices = @transform_4, window_bounds = array<i64: 1, 16, 32>}, {transform_indices = @transform_5, window_bounds = array<i64: 1, 16, 1>}]} {
    %c0 = arith.constant 0 : index
    %c0_0 = arith.constant 0 : index
    %c0_1 = arith.constant 0 : index
    %0 = vector.load %arg2[%c0, %c0_0, %c0_1] : memref<1x16x64xf32, #tpu.memory_space<vmem>>, vector<1x16x64xf32>
    %1 = vector.shape_cast %0 : vector<1x16x64xf32> to vector<16x64xf32>
    %c0_2 = arith.constant 0 : index
    %c0_3 = arith.constant 0 : index
    %2 = vector.load %arg3[%c0_2, %c0_3] : memref<64x32xf32, #tpu.memory_space<vmem>>, vector<64x32xf32>
    %cst = arith.constant dense<0.000000e+00> : vector<16x32xf32>
    %3 = tpu.matmul %1, %2, %cst {dimension_numbers = #tpu.dot_dimension_numbers<[1], [0], [0], [1], [0, 0, 1, 1], [], []>} : vector<16x64xf32>, vector<64x32xf32>, vector<16x32xf32> -> vector<16x32xf32>
    %c0_4 = arith.constant 0 : index
    %c0_5 = arith.constant 0 : index
    %4 = vector.load %arg4[%c0_4, %c0_5] : memref<1x32xf32, #tpu.memory_space<vmem>>, vector<1x32xf32>
    %5 = vector.broadcast %4 : vector<1x32xf32> to vector<16x32xf32>
    %6 = arith.addf %3, %5 : vector<16x32xf32>
    %7 = vector.broadcast %4 : vector<1x32xf32> to vector<16x32xf32>
    %8 = arith.cmpf one, %6, %7 : vector<16x32xf32>
    %cst_6 = arith.constant 1.000000e+00 : f32
    %cst_7 = arith.constant 0.000000e+00 : f32
    %9 = vector.broadcast %cst_6 : f32 to vector<16x32xf32>
    %10 = vector.broadcast %cst_7 : f32 to vector<16x32xf32>
    %11 = arith.select %8, %9, %10 : vector<16x32xi1>, vector<16x32xf32>
    %cst_8 = arith.constant dense<0xFF800000> : vector<16xf32>
    %12 = vector.multi_reduction <maximumf>, %11, %cst_8 [1] : vector<16x32xf32> to vector<16xf32>
    %13 = vector.shape_cast %12 : vector<16xf32> to vector<16x1xf32>
    %c0_9 = arith.constant 0 : index
    %c0_10 = arith.constant 0 : index
    %c0_11 = arith.constant 0 : index
    %14 = vector.load %arg7[%c0_9, %c0_10, %c0_11] : memref<1x16x1xf32, #tpu.memory_space<vmem>>, vector<1x16x1xf32>
    %15 = vector.shape_cast %14 : vector<1x16x1xf32> to vector<16x1xf32>
    %16 = vector.shape_cast %13 : vector<16x1xf32> to vector<1x16x1xf32>
    tpu.vector_store %arg7[%c0_9, %c0_10, %c0_11], %16 {strides = array<i32>} : memref<1x16x1xf32, #tpu.memory_space<vmem>>, vector<1x16x1xf32>,
    %c0_12 = arith.constant 0 : index
    %c0_13 = arith.constant 0 : index
    %17 = vector.load %arg5[%c0_12, %c0_13] : memref<16x32xf32, #tpu.memory_space<vmem>>, vector<16x32xf32>
    %18 = arith.addf %6, %17 : vector<16x32xf32>
    %c0_14 = arith.constant 0 : index
    %c0_15 = arith.constant 0 : index
    %c0_16 = arith.constant 0 : index
    %19 = vector.load %arg6[%c0_14, %c0_15, %c0_16] : memref<1x16x32xf32, #tpu.memory_space<vmem>>, vector<1x16x32xf32>
    %20 = vector.shape_cast %19 : vector<1x16x32xf32> to vector<16x32xf32>
    %21 = vector.shape_cast %18 : vector<16x32xf32> to vector<1x16x32xf32>
    tpu.vector_store %arg6[%c0_14, %c0_15, %c0_16], %21 {strides = array<i32>} : memref<1x16x32xf32, #tpu.memory_space<vmem>>, vector<1x16x32xf32>,
    return
  }
  func.func @transform_0(%arg0: i32, %arg1: i32) -> (i32, i32, i32) {
    %c0_i32 = arith.constant 0 : i32
    %c0_i32_0 = arith.constant 0 : i32
    return %arg0, %arg1, %c0_i32 : i32, i32, i32
  }
  func.func @transform_1(%arg0: i32, %arg1: i32) -> (i32, i32) {
    %c0_i32 = arith.constant 0 : i32
    %c0_i32_0 = arith.constant 0 : i32
    %c0_i32_1 = arith.constant 0 : i32
    return %c0_i32, %c0_i32_0 : i32, i32
  }
  func.func @transform_2(%arg0: i32, %arg1: i32) -> (i32, i32) {
    %c0_i32 = arith.constant 0 : i32
    %c0_i32_0 = arith.constant 0 : i32
    %c0_i32_1 = arith.constant 0 : i32
    return %c0_i32, %c0_i32_0 : i32, i32
  }
  func.func @transform_3(%arg0: i32, %arg1: i32) -> (i32, i32) {
    %c0_i32 = arith.constant 0 : i32
    %c0_i32_0 = arith.constant 0 : i32
    return %arg1, %c0_i32 : i32, i32
  }
  func.func @transform_4(%arg0: i32, %arg1: i32) -> (i32, i32, i32) {
    %c0_i32 = arith.constant 0 : i32
    %c0_i32_0 = arith.constant 0 : i32
    return %arg0, %arg1, %c0_i32 : i32, i32, i32
  }
  func.func @transform_5(%arg0: i32, %arg1: i32) -> (i32, i32, i32) {
    %c0_i32 = arith.constant 0 : i32
    %c0_i32_0 = arith.constant 0 : i32
    return %arg0, %arg1, %c0_i32 : i32, i32, i32
  }
}

</mosaic_0001>

<bundles_post_ra>
// kernel: _forward_core.1
= control target key start
LH: loop header
LB: loop body
LE: loop exit
PB: predicated region body
PF: predicated region fallthrough
CT: control target
= control target key end

     0   :  { %s872_s0 = inlined_call_operand.vmem [shape: f32[2,16,64], index: 0, kind: input, shape index: {}]   ;;  %s873_s1 = inlined_call_operand.vmem [shape: f32[64,32], index: 1, kind: input, shape index: {}]   ;;  %s874_s2 = inlined_call_operand.vmem [shape: f32[1,32], index: 2, kind: input, shape index: {}]   ;;  %s875_s3 = inlined_call_operand.vmem [shape: f32[16,32], index: 3, kind: input, shape index: {}]   ;;  %s876_s4 = inlined_call_operand.hbm [shape: f32[2,16,32], index: 4, kind: output, shape index: {0}]   ;;  %s877_s5 = inlined_call_operand.vmem [shape: f32[2,16,1], index: 5, kind: output, shape index: {1}]  }
   0x1   :  { %879 = sst [smem:[#allocation5_spill]] %s872_s0 }
   0x2   :  { %11 = vsyncpa [#allocation3], 0 }
   0x3   :  { %13 = vsyncpa [#allocation3 + $0x1], 0  ;;  %s727_s18 = smov 0   ;;  %s729_s19 = smov 0  }
   0x4   :  { %s731_s20 = smov 0   ;;  %s733_s21 = smov 0  }
   0x5   :  { %s735_s22 = smov 0   ;;  %s737_s23 = smov 0  }
   0x6 LB: > { %s526_s24 = sadd.s32 4294967295, %s692_s23   ;;  %s527_s25 = sadd.s32 4294967294, %s692_s23   ;;  %s692_s23 = sphi %s737_s23, %s19_s23   ;;  %s688_s22 = sphi %s735_s22, %s888_s22   ;;  %s684_s21 = sphi %s733_s21, %s887_s21   ;;  %s680_s20 = sphi %s731_s20, %s886_s20   ;;  %s676_s19 = sphi %s729_s19, %s885_s19   ;;  %s672_s18 = sphi %s727_s18, %s884_s18  }
   0x7   : > { %s31_s26 = sadd.s32 1, %s688_s22  ;;  %s136_s27 = sadd.s32 1, %s680_s20 }
   0x8   : > { %p33_p0 = scmp.ge.s32.totalorder %s31_s26, 2  ;;  %p146_p1 = scmp.ne.s32.totalorder %s680_s20, %s676_s19 }
   0x9   : > { %p147_p2 = scmp.eq.s32.totalorder %s526_s24, 1  ;;  %p152_p3 = scmp.ne.s32.totalorder %s676_s19, %s672_s18 }
   0xa   : > { %s890_s26 = smov (%p33_p0, %s31_s26), 0  ;;  %p153_p5 = scmp.eq.s32.totalorder %s527_s25, 1 }
   0xb   : > { %p767_p4 = por %p147_p2, %p146_p1  ;;  %s131_s29 = ssub.s32 %s688_s22, %s890_s26 }
   0xc   : > { %p531_p6 = scmp.ge.s32.totalorder %s692_s23, 1  ;;  %p134_p7 = scmp.eq.s32.totalorder %s131_s29, 0 }
   0xd   : > { %p774_p8 = por %p153_p5, %p152_p3  ;;  %p227_p9 = scmp.lt.s32.totalorder %s692_s23, 3 }
   0xe   : > { %s780_s6 = scalar_select %p134_p7, %s680_s20, %s136_s27  }
   0xf   : > { %p228_p10 = pnand %p531_p6, %p227_p9 }
  0x10   : > { %p274_p11 = scmp.lt.s32.totalorder (!%p228_p10), %s684_s21, 1  ;;  %s882_s0 = sld [smem:[#allocation5_spill]] (!%p228_p10) }
  0x11   : > { %231 = sbr.rel (%p228_p10) target bundleno = 294 (0x126), region = 36  ;;  %s259_s14 = sand.u32 (!%p228_p10), 1, %s676_s19  }
  0x12   : > { %s532_s15 = sshll.u32 (!%p228_p10), %s259_s14, 4  ;;  %s546_s25 = sshll.u32 (!%p228_p10), %s684_s21, 4 }
  0x13   : > { %s387_s7 = scalar_lea.hbm (!%p228_p10), %s876_s4, %s546_s25  ;;  %s261_s12 = scalar_lea.vmem (!%p228_p10), [#allocation2], %s532_s15 }
  0x14   : > { %s634_s27 = scalar_lea.hbm (!%p228_p10), %s876_s4, 32 }
  0x16   : > { %v309_v0 = vld [vmem:[%s873_s1 + $0x38] sm:$0xff]  ;;  %v308_v1 = vld [vmem:[%s873_s1 + $0x30] sm:$0xff]  ;;  %v307_v2 = vld [vmem:[%s873_s1 + $0x28] sm:$0xff]  ;;  %s793_s13 = scalar_select %p274_p11, %s684_s21, 1  ;;  %vm314_vm0 = vcmask 523264   ;;  %vm348_vm1 = vcmask 261120  }
  0x17   : > { %329 = vmatpush.msra.mxu0 %v309_v0  ;;  %547 = vmatpush.msra.mxu1 %v309_v0  ;;  %v306_v3 = vld [vmem:[%s873_s1 + $0x20] sm:$0xff]  ;;  %v305_v4 = vld [vmem:[%s873_s1 + $0x18] sm:$0xff]  ;;  %v304_v5 = vld [vmem:[%s873_s1 + $0x10] sm:$0xff]  ;;  %v694_v19 = vmov 0.0   ;;  %s365_s21 = scalar_lea.sflag [#allocation3], %s259_s14 }
  0x18   : > { %s878_s24 = sshll.u32 %s793_s13, 4  ;;  %v303_v6 = vld [vmem:[%s873_s1 + $0x8] sm:$0xff]  ;;  %v302_v7 = vld [vmem:[%s873_s1] sm:$0xff] }
  0x19   : > { %330 = vmatpush.msra.mxu0 %v308_v1  ;;  %548 = vmatpush.msra.mxu1 %v308_v1  ;;  %s281_s10 = scalar_lea.vmem %s882_s0, %s878_s24  ;;  %v613_v10 = vld [vmem:[%s874_s2] ss:$0 sm:$0xff]  ;;  %v359_v14 = vld [vmem:[%s875_s3 + $0x8] sm:$0xff]  ;;  %s388_s24 = sshll.u32 %s261_s12, 4  ;;  %s389_s24 = int_to_ptr.vmem [resolvable:$true] %s388_s24 }
  0x1a   : > { %v300_v8 = vld [vmem:[%s281_s10] sm:$0xff]  ;;  %v301_v9 = vld [vmem:[%s281_s10 + $0x8] sm:$0xff]  ;;  %s390_s0 = sshll.u32 %s387_s7, 4  ;;  %s391_s0 = int_to_ptr.hbm [resolvable:$true] %s390_s0 }
  0x1b   : > { %331 = vmatpush.msra.mxu0 %v307_v2  ;;  %549 = vmatpush.msra.mxu1 %v307_v2  ;;  %v358_v12 = vld [vmem:[%s875_s3] sm:$0xff]  ;;  %s628_s15 = sshra.s32 %s391_s0, 4  ;;  %s629_s15 = int_to_ptr.hbm [resolvable:$true] %s628_s15 }
  0x1c   : > { %s630_s16 = scalar_lea.hbm %s629_s15, 16  ;;  %p635_p1 = scmp.lt.s32.totalorder %s629_s15, %s876_s4 }
  0x1d   : > { %332 = vmatpush.msra.mxu0 %v306_v3  ;;  %550 = vmatpush.msra.mxu1 %v306_v3  ;;  %p631_p12 = scmp.ne.s32.totalorder %s629_s15, %s630_s16  ;;  %p636_p2 = scmp.lt.s32.totalorder %s634_s27, %s630_s16 }
  0x1f   : > { %333 = vmatpush.msra.mxu0 %v305_v4  ;;  %551 = vmatpush.msra.mxu1 %v305_v4  ;;  %p632_p13 = pnand %p631_p12, %p767_p4  ;;  %p637_p3 = por %p636_p2, %p635_p1 }
  0x21   : > { %334 = vmatpush.msra.mxu0 %v304_v5  ;;  %552 = vmatpush.msra.mxu1 %v304_v5  ;;  %p633_p0 = pneg %p632_p13 }
  0x23   : > { %335 = vmatpush.msra.mxu0 %v303_v6  ;;  %553 = vmatpush.msra.mxu1 %v303_v6  ;;  %p638_p5 = pnand %p637_p3, %p633_p0 }
  0x25   : > { %336 = vmatpush.msra.mxu0 %v302_v7  ;;  %554 = vmatpush.msra.mxu1 %v302_v7 }
  0x26   : > { %537 = vmatmul.msk.f32.vlgmr.msra.gmra.mxu0 %vm314_vm0, %v300_v8  ;;  %538 = vmatmul.msk.f32.vlgmr.msra.gmra.mxu1 %vm314_vm0, %v301_v9 }
  0xa3   : > { %v338_v11 = vpop.f32.mrf.mxu0  ;;  %v341_v13 = vpop.f32.mrf.mxu1 }
  0xa4   : > { %v339_v15 = vadd.f32 %v613_v10, %v338_v11  ;;  %v342_v16 = vadd.f32 %v613_v10, %v341_v13 }
  0xa6   : > { %v360_v17 = vadd.f32 %v358_v12, %v339_v15  ;;  %vm344_vm2 = vcmp.ne.f32.partialorder %v339_v15, %v613_v10  ;;  %v361_v18 = vadd.f32 %v359_v14, %v342_v16  ;;  %vm345_vm3 = vcmp.ne.f32.partialorder %v342_v16, %v613_v10 }
  0xa7   : > { %v346_v20 = vsel %vm344_vm2, 1.0, %v694_v19 }
  0xa8   : > { %v349_v21 = vsel %vm348_vm1, %v346_v20, -inf  ;;  %362 = vst.msk [vmem:[%s261_s12] sm:$0xff] %vm348_vm1, %v360_v17 }
  0xa9   : > { %350 = vmax.xlane.f32.xlu0 %v349_v21  ;;  %363 = vst.msk [vmem:[%s261_s12 + $0x8] sm:$0xff] %vm348_vm1, %v361_v18 }
  0xaa   : > { %641 = shalt.err (!%p638_p5)
}
  0xab   : > { %s695_s14 = smov 128   ;;  %s696_s8 = smov 8   ;;  %v347_v22 = vsel %vm345_vm3, 1.0, %v694_v19  ;;  %vm355_vm4 = vcmask 7168  }
  0xac   : > { %555 = dma.vmem_to_hbm [thread:$0]  (%p767_p4), %s389_s24, 256, %s391_s0, %s365_s21, %s695_s14, %s695_s14, %s696_s8   ;;  %v352_v23 = vsel %vm348_vm1, %v347_v22, -inf }
  0xad   : > { %s883_s9 = sshll.u32 %s793_s13, 4 }
  0xae   : > { %s298_s12 = scalar_lea.vmem %s877_s5, %s883_s9 }
  0xb1   : > { %353 = vmax.xlane.f32.xlu0 %v352_v23 }
 0x11c   : > { %v351_v24 = vpop.xlane.xlu0 %350 }
 0x11d   : > { %356 = vst.msk [vmem:[%s298_s12] sm:$0xff] %vm355_vm4, %v351_v24 }
 0x124   : > { %v354_v25 = vpop.xlane.xlu0 %353 }
 0x125   : > { %357 = vst.msk [vmem:[%s298_s12 + $0x8] sm:$0xff] %vm355_vm4, %v354_v25 }
 0x126 PF: > { %p561_p4 = scmp.ge.s32.totalorder %s692_s23, 2  ;;  %s409_s0 = sand.u32 1, %s672_s18  }
 0x127   : > { %s410_s28 = scalar_lea.sflag [#allocation3], %s409_s0 }
 0x128   : > { %p558_p6 = pnand %p561_p4, %p774_p8 }
 0x12a   : > { %p559_p7 = pneg %p558_p6 }
 0x12c   : > { %667 = dma.done.wait (%p559_p7), %s410_s28, 256  }
 0x12d   : > { %669 = vsyncadd (%p559_p7), %s410_s28, 4294967040  ;;  %s19_s23 = sadd.s32 1, %s692_s23   ;;  %s884_s18 = smov %s676_s19 }
 0x12e   : > { %p16_p9 = scmp.ge.s32.totalorder %s19_s23, 4   ;;  %s885_s19 = smov %s680_s20 }
 0x12f   : > { %s886_s20 = smov %s780_s6  ;;  %s887_s21 = smov %s688_s22 }
 0x130   : > { %s888_s22 = smov %s890_s26  ;;  %18 = sbr.rel (!%p16_p9) target bundleno = 6 (0x6), region = 86 }
 0x135   :  { %428 = vsyncpa [#allocation3], 1 }
 0x136   :  { %430 = vsyncpa [#allocation3 + $0x1], 1 }

</bundles_post_ra>
